<compile_context>
chip_gen: v6e
topology: v6e:2x2x1
jax: 0.10.0
libtpu: 0.0.40
codegen_flags: <defaults>
</compile_context>

<pallas_src>
import jax
import jax.numpy as jnp
from jax.experimental import pallas as pl
from jax.experimental.pallas import tpu as pltpu


_LANES = 128
_TILE_BYTES = 4 * 1024 * 1024       # per-x-tile VMEM budget (Pallas double-buffers it)
_VMEM_LIMIT = 32 * 1024 * 1024      # scoped VMEM request; <= defaults on v6e/v7x, raises v5e's 16 MiB
_PACKED_MAX_IN_DIM = 16             # use the lane-packed path for tiny feature dims


def _round_up(n, m):
    return ((n + m - 1) // m) * m


def _round_down(n, m):
    return (n // m) * m


def _packed_kernel(x_ref, w_ref, b_ref, o_ref):
    # x_ref: (TR, 128*D) lane-dense samples; w_ref: (128*D, 128) block-diagonal weight
    # b_ref: (1, 1) scalar bias in SMEM;     o_ref: (TR, 128) lane+sublane-dense outputs
    z = jnp.dot(x_ref[...], w_ref[...], preferred_element_type=jnp.float32)
    o_ref[...] = jax.nn.sigmoid(z + b_ref[0, 0]).astype(o_ref.dtype)


def _rowmajor_kernel(x_ref, w_ref, b_ref, o_ref):
    # x_ref: (TB, D); w_ref: (1, D); b_ref: (1, 1) SMEM; o_ref: (1, TB) lane-dense.
    z = jax.lax.dot_general(
        w_ref[...], x_ref[...],
        dimension_numbers=(((1,), (1,)), ((), ())),   # contract features: (1,D)·(TB,D) -> (1,TB)
        preferred_element_type=jnp.float32,
    )
    o_ref[...] = jax.nn.sigmoid(z + b_ref[0, 0]).astype(o_ref.dtype)


def _forward_packed(x, weight, bias):
    """Lane-packed path for in_dim <= 16: dense input DMA and dense 2-D output."""
    batch, in_dim = x.shape
    row_elems = _LANES * in_dim                       # one packed row = 128 samples

    padded_batch = _round_up(batch, _LANES)
    x_flat = x.reshape(-1)                            # contiguous row-major -> free reshape
    if padded_batch != batch:
        # Pad copy only happens for the < 128-row remainder case; multiples of 128 are zero-copy.
        x_flat = jnp.pad(x_flat, (0, (padded_batch - batch) * in_dim))
    n_rows = padded_batch // _LANES
    x_packed = x_flat.reshape(n_rows, row_elems)

    # Block-diagonal weight: Wp[j*D + d, j] = w[d]; x_packed @ Wp puts one sample per output lane.
    w_vec = weight.reshape(in_dim).astype(jnp.float32)
    w_packed = jnp.einsum(
        "jk,d->jdk", jnp.eye(_LANES, dtype=jnp.float32), w_vec
    ).reshape(row_elems, _LANES)
    b2d = bias.reshape(1, 1).astype(jnp.float32)

    # Row tile from the VMEM byte budget (each packed row is 128*D f32, fully lane-dense).
    tr_budget = max(8, _round_down(_TILE_BYTES // (row_elems * 4), 8))
    tr = min(tr_budget, n_rows)

    grid = (pl.cdiv(n_rows, tr),)
    out = pl.pallas_call(
        _packed_kernel,
        out_shape=jax.ShapeDtypeStruct((n_rows, _LANES), jnp.float32),
        grid=grid,
        in_specs=[
            pl.BlockSpec((tr, row_elems), lambda i: (i, 0)),          # packed x tile (pipelined)
            pl.BlockSpec((row_elems, _LANES), lambda i: (0, 0)),      # constant weight block
            pl.BlockSpec(memory_space=pltpu.MemorySpace.SMEM),        # scalar bias
        ],
        out_specs=pl.BlockSpec((tr, _LANES), lambda i: (i, 0)),       # lane+sublane-dense output
        compiler_params=pltpu.CompilerParams(
            dimension_semantics=("parallel",),
            vmem_limit_bytes=_VMEM_LIMIT,
        ),
    )(x_packed, w_packed, b2d)
    return out.reshape(-1)[:batch]


def _forward_rowmajor(x, weight, bias):
    """Row-major MXU path for wider feature dims (no whole-array padding of x)."""
    batch, in_dim = x.shape
    w2d = weight.astype(jnp.float32)
    b2d = bias.reshape(1, 1).astype(jnp.float32)

    # VMEM footprint of a (tb, in_dim) f32 block is tb * round_up(in_dim, 128) * 4 bytes
    # (lanes pad to 128), so budget against the padded width, not the raw one.
    bytes_per_row = _round_up(in_dim, _LANES) * 4
    tb_budget = max(_LANES, _round_down(_TILE_BYTES // bytes_per_row, _LANES))
    tb = min(tb_budget, _round_up(batch, _LANES))
    # TODO(synk): for in_dim large enough that even a 128-row tile exceeds the VMEM budget
    # (~>16K features), add a feature-axis grid dim with an f32 accumulator scratch.

    grid = (pl.cdiv(batch, tb),)          # x stays unpadded; the tail block reads OOB rows
    padded_out = grid[0] * tb             # only the tiny output is over-allocated (sliced below)

    out = pl.pallas_call(
        _rowmajor_kernel,
        out_shape=jax.ShapeDtypeStruct((1, padded_out), jnp.float32),
        grid=grid,
        in_specs=[
            pl.BlockSpec((tb, in_dim), lambda i: (i, 0)),             # x tile (pipelined)
            pl.BlockSpec((1, in_dim), lambda i: (0, 0)),              # constant weight block
            pl.BlockSpec(memory_space=pltpu.MemorySpace.SMEM),        # scalar bias
        ],
        out_specs=pl.BlockSpec((1, tb), lambda i: (0, i)),            # lane-dense output block
        compiler_params=pltpu.CompilerParams(
            dimension_semantics=("parallel",),
            vmem_limit_bytes=_VMEM_LIMIT,
        ),
    )(x, w2d, b2d)
    return out[0, :batch]


def perceptron_forward(x, weight, bias):
    """Matches torch.sigmoid(nn.Linear(input_dim, 1)(x)).squeeze().

    Args:
      x:      (batch, input_dim) float
      weight: (1, input_dim) float  -- PyTorch nn.Linear weight layout
      bias:   (1,) float
    Returns:
      (batch,) float32, or a 0-d scalar when batch == 1 (torch .squeeze() semantics).
    """
    x = jnp.asarray(x, jnp.float32)
    batch, in_dim = x.shape
    assert weight.shape == (1, in_dim)

    if in_dim <= _PACKED_MAX_IN_DIM:
        res = _forward_packed(x, weight, bias)
    else:
        res = _forward_rowmajor(x, weight, bias)

    if batch == 1:
        return res.reshape(())    # torch .squeeze() collapses (1, 1) -> 0-d scalar
    return res


if __name__ == "__main__":
    input_dim = 2

    key = jax.random.PRNGKey(0)
    kx1, kx2, kx3, kx4, kw, kb, kw2, kb2 = jax.random.split(key, 8)

    # Deterministic synthetic parameters (same shapes as nn.Linear(2, 1)).
    weight = 0.5 * jax.random.normal(kw, (1, input_dim), dtype=jnp.float32)
    bias = 0.1 * jax.random.normal(kb, (1,), dtype=jnp.float32)

    def reference(xv, w, b):
        return jnp.squeeze(jax.nn.sigmoid(xv @ w.T + b))

    # Small batch (packed path; remainder rows padded up to one 128-sample row).
    x1 = jax.random.normal(kx1, (8, input_dim), dtype=jnp.float32)
    y1 = jax.block_until_ready(perceptron_forward(x1, weight, bias))
    assert y1.shape == (8,)
    assert jnp.allclose(y1, reference(x1, weight, bias), atol=1e-5, rtol=1e-5)

    # Multiple-of-128 batch (packed path; zero-copy reshape, no padding at all).
    x2 = jax.random.normal(kx2, (256, input_dim), dtype=jnp.float32)
    y2 = jax.block_until_ready(perceptron_forward(x2, weight, bias))
    assert y2.shape == (256,)
    assert jnp.allclose(y2, reference(x2, weight, bias), atol=1e-5, rtol=1e-5)

    # batch == 1 matches torch .squeeze() -> 0-d scalar.
    x3 = jax.random.normal(kx3, (1, input_dim), dtype=jnp.float32)
    y3 = jax.block_until_ready(perceptron_forward(x3, weight, bias))
    assert y3.shape == ()
    assert jnp.allclose(y3, reference(x3, weight, bias), atol=1e-5, rtol=1e-5)

    # Wider feature dim exercises the row-major MXU path (same forward semantics).
    wide_dim = 32
    weight_w = 0.5 * jax.random.normal(kw2, (1, wide_dim), dtype=jnp.float32)
    bias_w = 0.1 * jax.random.normal(kb2, (1,), dtype=jnp.float32)
    x4 = jax.random.normal(kx4, (300, wide_dim), dtype=jnp.float32)
    y4 = jax.block_until_ready(perceptron_forward(x4, weight_w, bias_w))
    assert y4.shape == (300,)
    assert jnp.allclose(y4, reference(x4, weight_w, bias_w), atol=1e-5, rtol=1e-5)

    print("KERNEL_OK")
</pallas_src>

<mosaic_0001>
module attributes {stable_mosaic.version = 11 : i64} {
  func.func @_packed_kernel(%arg0: i32, %arg1: memref<1x256xf32, #tpu.memory_space<vmem>>, %arg2: memref<256x128xf32, #tpu.memory_space<vmem>>, %arg3: memref<1x1xf32, #tpu.memory_space<smem>>, %arg4: memref<1x128xf32, #tpu.memory_space<vmem>>) attributes {dimension_semantics = [#tpu.dimension_semantics<parallel>], iteration_bounds = array<i64: 1>, scalar_prefetch = 0 : i64, scratch_operands = 0 : i64, tpu.core_type = #tpu.core_type<tc>, window_params = [{transform_indices = @transform_0, window_bounds = array<i64: 1, 256>}, {pipeline_mode = #tpu.pipeline_mode<synchronous>, transform_indices = @transform_1, window_bounds = array<i64: 256, 128>}, {transform_indices = @transform_2, window_bounds = array<i64: 1, 1>}, {transform_indices = @transform_3, window_bounds = array<i64: 1, 128>}]} {
    %c0 = arith.constant 0 : index
    %c0_0 = arith.constant 0 : index
    %0 = vector.load %arg1[%c0, %c0_0] : memref<1x256xf32, #tpu.memory_space<vmem>>, vector<1x256xf32>
    %c0_1 = arith.constant 0 : index
    %c0_2 = arith.constant 0 : index
    %1 = vector.load %arg2[%c0_1, %c0_2] : memref<256x128xf32, #tpu.memory_space<vmem>>, vector<256x128xf32>
    %cst = arith.constant dense<0.000000e+00> : vector<1x128xf32>
    %2 = tpu.matmul %0, %1, %cst {dimension_numbers = #tpu.dot_dimension_numbers<[1], [0], [0], [1], [0, 0, 1, 1], [], []>} : vector<1x256xf32>, vector<256x128xf32>, vector<1x128xf32> -> vector<1x128xf32>
    %c0_3 = arith.constant 0 : index
    %c0_4 = arith.constant 0 : index
    %3 = memref.load %arg3[%c0_3, %c0_4] : memref<1x1xf32, #tpu.memory_space<smem>>
    %4 = vector.broadcast %3 : f32 to vector<1x128xf32>
    %5 = arith.addf %2, %4 : vector<1x128xf32>
    %6 = arith.negf %5 : vector<1x128xf32>
    %7 = math.exp %6 : vector<1x128xf32>
    %cst_5 = arith.constant 1.000000e+00 : f32
    %8 = vector.broadcast %cst_5 : f32 to vector<1x128xf32>
    %9 = arith.addf %8, %7 : vector<1x128xf32>
    %10 = arith.divf %8, %9 : vector<1x128xf32>
    %c0_6 = arith.constant 0 : index
    %c0_7 = arith.constant 0 : index
    %11 = vector.load %arg4[%c0_6, %c0_7] : memref<1x128xf32, #tpu.memory_space<vmem>>, vector<1x128xf32>
    tpu.vector_store %arg4[%c0_6, %c0_7], %10 {strides = array<i32>} : memref<1x128xf32, #tpu.memory_space<vmem>>, vector<1x128xf32>,
    return
  }
  func.func @transform_0(%arg0: i32) -> (i32, i32) {
    %c0_i32 = arith.constant 0 : i32
    %c0_i32_0 = arith.constant 0 : i32
    return %arg0, %c0_i32 : i32, i32
  }
  func.func @transform_1(%arg0: i32) -> (i32, i32) {
    %c0_i32 = arith.constant 0 : i32
    %c0_i32_0 = arith.constant 0 : i32
    %c0_i32_1 = arith.constant 0 : i32
    return %c0_i32, %c0_i32_0 : i32, i32
  }
  func.func @transform_2(%arg0: i32) -> (i32, i32) {
    %c0_i32 = arith.constant 0 : i32
    %c0_i32_0 = arith.constant 0 : i32
    %c0_i32_1 = arith.constant 0 : i32
    return %c0_i32, %c0_i32_0 : i32, i32
  }
  func.func @transform_3(%arg0: i32) -> (i32, i32) {
    %c0_i32 = arith.constant 0 : i32
    %c0_i32_0 = arith.constant 0 : i32
    return %arg0, %c0_i32 : i32, i32
  }
}

</mosaic_0001>

<bundles_post_ra>
// kernel: tpu_custom_call.1
= control target key start
LH: loop header
LB: loop body
LE: loop exit
PB: predicated region body
PF: predicated region fallthrough
CT: control target
= control target key end

     0   :  { %9 = vsyncpa [#allocation4], 0  ;;  %s292_s0 = inlined_call_operand.vmem [shape: f32[1,256], index: 0, kind: input, shape index: {}]   ;;  %s293_s1 = inlined_call_operand.hbm [shape: f32[256,128], index: 1, kind: input, shape index: {}]   ;;  %s294_s2 = inlined_call_operand.<no memory space> [shape: f32[1,1], index: 2, kind: input, shape index: {}]   ;;  %s295_s3 = inlined_call_operand.hbm [shape: f32[1,128], index: 3, kind: output, shape index: {}]  }
   0x1   :  { %10 = vsyncpa [#allocation5], 0  ;;  %s256_s12 = smov [#allocation3]  }
   0x2   :  { %s18_s13 = sshll.u32 %s256_s12, 4  ;;  %s19_s13 = int_to_ptr.vmem [resolvable:$true] %s18_s13 }
   0x3   :  { %s220_s14 = scalar_lea.vmem %s19_s13, 4096  ;;  %p225_p1 = scmp.lt.s32.totalorder %s19_s13, %s19_s13 }
   0x4   :  { %p221_p0 = scmp.ne.s32.totalorder %s19_s13, %s220_s14  ;;  %p226_p2 = scmp.lt.s32.totalorder %s220_s14, %s220_s14 }
   0x6   :  { %p227_p3 = por %p226_p2, %p225_p1 }
   0x8   :  { %p228_p4 = pnand %p227_p3, %p221_p0 }
   0xa   :  { %231 = shalt.err (!%p228_p4)
}
   0xb   :  { %s257_s15 = smov 128   ;;  %s258_s16 = smov 8  }
   0xc   :  { %24 = dma.hbm_to_vmem [thread:$0]  %s293_s1, 4096, %s19_s13, [#allocation4], %s257_s15, %s257_s15, %s258_s16  }
   0xd   :  { %252 = dma.done.wait [#allocation4], 4096  }
   0xe   :  { %253 = vsyncadd [#allocation4], 4294963200  ;;  %v66_v0 = vlaneseq  ;;  %v62_v1 = vld [vmem:[#allocation3 + $0xf8] sm:$0xff]  ;;  %v61_v3 = vld [vmem:[#allocation3 + $0xf0] sm:$0xff]  ;;  %v64_v40 = vstv %s294_s2  ;;  %s259_s21 = smov [#allocation6]  }
   0xf   :  { %v46_v2 = vld [vmem:[#allocation3 + $0x78] sm:$0xff]  ;;  %169 = vmatprep.subr.mxu0 %v62_v1  ;;  %v45_v4 = vld [vmem:[#allocation3 + $0x70] sm:$0xff]  ;;  %v60_v5 = vld [vmem:[#allocation3 + $0xe8] sm:$0xff]  ;;  %s159_s22 = sshll.u32 %s259_s21, 4  ;;  %s160_s22 = int_to_ptr.vmem [resolvable:$true] %s159_s22 }
  0x10   :  { %170 = vmatpush3.msra.mxu0 %v46_v2  ;;  %v44_v6 = vld [vmem:[#allocation3 + $0x68] sm:$0xff]  ;;  %v67_v7 = vshrl.u32 %v66_v0, 7  ;;  %v59_v8 = vld [vmem:[#allocation3 + $0xe0] sm:$0xff]  ;;  %v58_v10 = vld [vmem:[#allocation3 + $0xd8] sm:$0xff]  ;;  %s232_s23 = scalar_lea.vmem %s160_s22, 16  ;;  %s236_s24 = scalar_lea.vmem %s160_s22, 32 }
  0x11   :  { %171 = vmatprep.subr.mxu0 %v61_v3  ;;  %v43_v9 = vld [vmem:[#allocation3 + $0x60] sm:$0xff]  ;;  %v42_v11 = vld [vmem:[#allocation3 + $0x58] sm:$0xff]  ;;  %v57_v13 = vld [vmem:[#allocation3 + $0xd0] sm:$0xff]  ;;  %p233_p5 = scmp.ne.s32.totalorder %s160_s22, %s232_s23  ;;  %p237_p6 = scmp.lt.s32.totalorder %s160_s22, %s160_s22 }
  0x12   :  { %172 = vmatpush3.msra.mxu0 %v45_v4  ;;  %v72_v12 = vsub.s32 1, %v67_v7  ;;  %v41_v14 = vld [vmem:[#allocation3 + $0x50] sm:$0xff]  ;;  %v56_v15 = vld [vmem:[#allocation3 + $0xc8] sm:$0xff]  ;;  %v30_v16 = vld [vmem:[%s292_s0] sm:$0x3]  ;;  %v68_v33 = vsub.s32 0, %v67_v7  ;;  %p238_p7 = scmp.lt.s32.totalorder %s236_s24, %s232_s23 }
  0x13   :  { %173 = vmatprep.subr.mxu0 %v60_v5  ;;  %v40_v17 = vld [vmem:[#allocation3 + $0x48] sm:$0xff]  ;;  %v55_v19 = vld [vmem:[#allocation3 + $0xc0] sm:$0xff]  ;;  %v54_v21 = vld [vmem:[#allocation3 + $0xb8] sm:$0xff] }
  0x14   :  { %174 = vmatpush3.msra.mxu0 %v44_v6  ;;  %v73_v18 = vrot.slane %v30_v16, %v72_v12  ;;  %v39_v20 = vld [vmem:[#allocation3 + $0x40] sm:$0xff]  ;;  %v38_v22 = vld [vmem:[#allocation3 + $0x38] sm:$0xff]  ;;  %v53_v23 = vld [vmem:[#allocation3 + $0xb0] sm:$0xff]  ;;  %v69_v38 = vrot.slane %v30_v16, %v68_v33  ;;  %p239_p8 = por %p238_p7, %p237_p6 }
  0x15   :  { %175 = vmatprep.subr.mxu0 %v59_v8  ;;  %v37_v24 = vld [vmem:[#allocation3 + $0x30] sm:$0xff]  ;;  %v52_v25 = vld [vmem:[#allocation3 + $0xa8] sm:$0xff]  ;;  %v51_v27 = vld [vmem:[#allocation3 + $0xa0] sm:$0xff] }
  0x16   :  { %176 = vmatpush3.msra.mxu0 %v43_v9  ;;  %140 = vmatprep.mubr.f32.mxu0 %v73_v18  ;;  %v36_v26 = vld [vmem:[#allocation3 + $0x28] sm:$0xff]  ;;  %v35_v28 = vld [vmem:[#allocation3 + $0x20] sm:$0xff]  ;;  %v50_v29 = vld [vmem:[#allocation3 + $0x98] sm:$0xff]  ;;  %p240_p9 = pnand %p239_p8, %p233_p5 }
  0x17   :  { %177 = vmatprep.subr.mxu0 %v58_v10  ;;  %v34_v30 = vld [vmem:[#allocation3 + $0x18] sm:$0xff]  ;;  %v49_v31 = vld [vmem:[#allocation3 + $0x90] sm:$0xff]  ;;  %v48_v34 = vld [vmem:[#allocation3 + $0x88] sm:$0xff] }
  0x18   :  { %178 = vmatpush3.msra.mxu0 %v42_v11  ;;  %v33_v32 = vld [vmem:[#allocation3 + $0x10] sm:$0xff]  ;;  %v32_v35 = vld [vmem:[#allocation3 + $0x8] sm:$0xff]  ;;  %v47_v36 = vld [vmem:[#allocation3 + $0x80] sm:$0xff] }
  0x19   :  { %179 = vmatprep.subr.mxu0 %v57_v13  ;;  %v31_v37 = vld [vmem:[#allocation3] sm:$0xff] }
  0x1a   :  { %180 = vmatpush3.msra.mxu0 %v41_v14 }
  0x1b   :  { %181 = vmatprep.subr.mxu0 %v56_v15 }
  0x1c   :  { %182 = vmatpush3.msra.mxu0 %v40_v17 }
  0x1d   :  { %183 = vmatprep.subr.mxu0 %v55_v19 }
  0x1e   :  { %184 = vmatpush3.msra.mxu0 %v39_v20 }
  0x1f   :  { %185 = vmatprep.subr.mxu0 %v54_v21 }
  0x20   :  { %186 = vmatpush3.msra.mxu0 %v38_v22 }
  0x21   :  { %187 = vmatprep.subr.mxu0 %v53_v23 }
  0x22   :  { %188 = vmatpush3.msra.mxu0 %v37_v24 }
  0x23   :  { %189 = vmatprep.subr.mxu0 %v52_v25 }
  0x24   :  { %190 = vmatpush3.msra.mxu0 %v36_v26 }
  0x25   :  { %191 = vmatprep.subr.mxu0 %v51_v27 }
  0x26   :  { %192 = vmatpush3.msra.mxu0 %v35_v28 }
  0x27   :  { %193 = vmatprep.subr.mxu0 %v50_v29 }
  0x28   :  { %194 = vmatpush3.msra.mxu0 %v34_v30 }
  0x29   :  { %195 = vmatprep.subr.mxu0 %v49_v31 }
  0x2a   :  { %196 = vmatpush3.msra.mxu0 %v33_v32 }
  0x2b   :  { %197 = vmatprep.subr.mxu0 %v48_v34 }
  0x2c   :  { %198 = vmatpush3.msra.mxu0 %v32_v35 }
  0x2d   :  { %199 = vmatprep.subr.mxu0 %v47_v36 }
  0x2e   :  { %200 = vmatpush3.msra.mxu0 %v31_v37 }
  0x2f   :  { %141 = vmatmul.mubr.f32.vlgmr.msra.gmra.mxu0 %v69_v38 }
  0xef   :  { %v201_v39 = vpop.f32.mrf.mxu0 }
  0xf1   :  { %v202_v41 = vpop.f32.mrf.mxu0 }
  0xf2   :  { %v203_v42 = vadd.f32 %v202_v41, %v201_v39 }
  0xf4   :  { %v143_v43 = vadd.f32 %v203_v42, %v64_v40 }
  0xf6   :  { %v168_v44 = vmul.f32 -1.442695, %v143_v43 }
  0xf8   :  { %208 = vpow2.f32 %v168_v44 }
 0x105   :  { %v209_v45 = vpop.eup %208 }
 0x106   :  { %v149_v46 = vadd.f32 1.0, %v209_v45 }
 0x108   :  { %210 = vrcp.f32 %v149_v46 }
 0x115   :  { %v211_v47 = vpop.eup %210 }
 0x116   :  { %152 = vst [vmem:[#allocation6] sm:$0x1] %v211_v47 }
 0x117   :  { %243 = shalt.err (!%p240_p9)
}
 0x118   :  { %162 = dma.vmem_to_hbm [thread:$0]  %s160_s22, 16, %s295_s3, [#allocation5]  }
 0x119   :  { %254 = dma.done.wait [#allocation5], 16  }
 0x11a   :  { %255 = vsyncadd [#allocation5], 4294967280 }
 0x11b   :  { %166 = vsyncpa [#allocation4], 1 }
 0x11c   :  { %167 = vsyncpa [#allocation5], 1 }

</bundles_post_ra>
